<compile_context>
chip_gen: v5e
topology: v5e:2x2
jax: 0.10.0
libtpu: 0.0.40
codegen_flags: <defaults>
</compile_context>

<pallas_src>
import jax
import jax.numpy as jnp
from jax.experimental import pallas as pl
from jax.experimental.pallas import tpu as pltpu


def _build_banded_weight(weight_oihw, w_in, wo, stride, padding):
    """Banded (block-Toeplitz) weight of shape (KH, W*Cin, Wo*Cout).

    band[i, (w*stride + j - padding)*Cin + c, w*Cout + o] = weight[o, c, i, j]
    for taps that land inside the unpadded input width; taps that fall in the
    zero-padding are dropped, which implements ZeroPad2d along W.  The W stride
    is folded into the row index, so the kernel never needs strided lane slices.
    """
    cout, cin, kh, kw = weight_oihw.shape
    dtype = weight_oihw.dtype
    w_kkio = jnp.transpose(weight_oihw, (2, 3, 1, 0))            # (KH, KW, Cin, Cout)

    w_idx = jnp.arange(wo)                                        # output column
    j_idx = jnp.arange(kw)                                        # kernel column
    c_idx = jnp.arange(cin)
    o_idx = jnp.arange(cout)

    col_in = w_idx[:, None] * stride + j_idx[None, :] - padding   # (Wo, KW) input column
    valid = (col_in >= 0) & (col_in < w_in)                       # inside real input?
    col_in = jnp.clip(col_in, 0, w_in - 1)

    p = col_in[:, :, None] * cin + c_idx[None, None, :]           # (Wo, KW, Cin) band row
    q = w_idx[:, None] * cout + o_idx[None, :]                    # (Wo, Cout)    band col

    vals = jnp.broadcast_to(w_kkio[:, None], (kh, wo, kw, cin, cout))
    vals = vals * valid[None, :, :, None, None].astype(dtype)     # zero padded taps
    p_full = jnp.broadcast_to(p[:, :, :, None], (wo, kw, cin, cout)).reshape(-1)
    q_full = jnp.broadcast_to(q[:, None, None, :], (wo, kw, cin, cout)).reshape(-1)

    band = jnp.zeros((kh, w_in * cin, wo * cout), dtype)
    # .add (not .set): clipped out-of-range entries contribute exact zeros even
    # if they collide with a valid (p, q) slot.
    return band.at[:, p_full, q_full].add(vals.reshape(kh, -1))


def _make_conv2d_block_kernel(nb, h, ho, wo, cout, kh, stride, padding):
    """Kernel closed over the static conv geometry."""
    use_scratch = padding > 0

    def kernel(x_ref, band_ref, bias_ref, o_ref, *scratch):
        # x_ref:    (nb, H, W*Cin)        lane-flattened NHWC input (unpadded)
        # band_ref: (KH, W*Cin, Wo*Cout)  banded weights (W-pad + W-stride folded in)
        # bias_ref: (1, Wo*Cout)          bias tiled across Wo (lane-dense)
        # o_ref:    (nb, Ho, Wo*Cout)     lane-dense output
        if use_scratch:
            xpad_ref = scratch[0]                                # (nb, H+2p, W*Cin)
            # Fused ZeroPad2d along H: zero halo rows + copy interior (VMEM only,
            # no HBM round trip for the padded activation).
            xpad_ref[...] = jnp.zeros_like(xpad_ref)
            xpad_ref[:, padding:padding + h, :] = x_ref[...]
            src = xpad_ref
        else:
            src = x_ref

        bias2d = bias_ref[...]                                   # (1, Wo*Cout)
        for b in range(nb):                                      # unrolled, nb is small
            acc = jnp.zeros((ho, wo * cout), jnp.float32)
            if stride != 1:
                xb = src[b]                                      # (Hpad, W*Cin) value
            for i in range(kh):                                  # KH MXU pushes, K = W*Cin
                if stride == 1:
                    lhs = src[b, i:i + ho, :]                    # contiguous row window
                else:
                    lhs = xb[i:i + (ho - 1) * stride + 1:stride, :]
                acc = acc + jnp.dot(lhs, band_ref[i],
                                    preferred_element_type=jnp.float32)
            y = jnp.maximum(acc + bias2d, 0.0)                   # bias + ReLU, lane-dense
            o_ref[b] = y.astype(o_ref.dtype)                     # full-width store

    return kernel


def conv2d_block_forward(x_nchw, weight_oihw, bias, *, stride, padding, batch_block=1):
    """Forward pass of Conv2dBlock(norm='none', activation='relu', pad_type='zero').

    x_nchw:      (N, Cin, H, W)   -- PyTorch NCHW layout
    weight_oihw: (Cout, Cin, KH, KW)
    bias:        (Cout,)
    returns:     (N, Cout, Ho, Wo) in NCHW
    """
    n, cin, h, w = x_nchw.shape
    cout, cin_w, kh, kw = weight_oihw.shape
    assert cin == cin_w
    assert n % batch_block == 0
    nb = batch_block

    hp, wp = h + 2 * padding, w + 2 * padding
    ho = (hp - kh) // stride + 1
    wo = (wp - kw) // stride + 1

    # Free layout plumbing (metadata reshape after the transpose); padding is
    # NOT done here -- it is fused into the kernel / banded weight.
    x_flat = jnp.transpose(x_nchw, (0, 2, 3, 1)).reshape(n, h, w * cin)
    band = _build_banded_weight(weight_oihw, w, wo, stride, padding)
    bias_row = jnp.tile(bias, wo).reshape(1, wo * cout)

    kernel = _make_conv2d_block_kernel(nb, h, ho, wo, cout, kh, stride, padding)
    scratch_shapes = (
        [pltpu.VMEM((nb, h + 2 * padding, w * cin), x_flat.dtype)]
        if padding > 0 else []
    )

    itemsize = jnp.dtype(x_flat.dtype).itemsize
    cost = pl.CostEstimate(
        flops=2 * n * ho * wo * cout * cin * kh * kw,
        transcendentals=0,
        bytes_accessed=(x_flat.size + band.size + bias_row.size
                        + n * ho * wo * cout) * itemsize,
    )

    out_flat = pl.pallas_call(
        kernel,
        out_shape=jax.ShapeDtypeStruct((n, ho, wo * cout), x_nchw.dtype),
        grid_spec=pltpu.PrefetchScalarGridSpec(
            num_scalar_prefetch=0,
            grid=(n // nb,),
            in_specs=[
                pl.BlockSpec((nb, h, w * cin), lambda g: (g, 0, 0)),
                pl.BlockSpec((kh, w * cin, wo * cout), lambda g: (0, 0, 0)),
                pl.BlockSpec((1, wo * cout), lambda g: (0, 0)),
            ],
            out_specs=pl.BlockSpec((nb, ho, wo * cout), lambda g: (g, 0, 0)),
            scratch_shapes=scratch_shapes,
        ),
        compiler_params=pltpu.CompilerParams(
            dimension_semantics=("parallel",)
        ),
        cost_estimate=cost,
    )(x_flat, band, bias_row)

    # (N, Ho, Wo*Cout) -> (N, Ho, Wo, Cout) is free; then back to NCHW.
    return jnp.transpose(out_flat.reshape(n, ho, wo, cout), (0, 3, 1, 2))


if __name__ == "__main__":
    # Conv2dBlock(input_dim=4, output_dim=8, kernel_size=3, stride=1, padding=1)
    N, CIN, H, W = 2, 4, 16, 16
    COUT, KH, KW = 8, 3, 3
    STRIDE, PADDING = 1, 1

    key = jax.random.PRNGKey(0)
    kx, kw_, kb = jax.random.split(key, 3)

    x = jax.random.normal(kx, (N, CIN, H, W), dtype=jnp.float32)
    # Deterministic synthetic parameters (same shapes as nn.Conv2d(4, 8, 3, 1)).
    fan_in = CIN * KH * KW
    weight = jax.random.normal(kw_, (COUT, CIN, KH, KW), dtype=jnp.float32) / jnp.sqrt(fan_in)
    bias = jax.random.normal(kb, (COUT,), dtype=jnp.float32) * 0.1

    y = conv2d_block_forward(x, weight, bias, stride=STRIDE, padding=PADDING)
    y = jax.block_until_ready(y)

    # Sanity check against XLA's conv (same semantics as F.conv2d + ReLU).
    ref = jax.lax.conv_general_dilated(
        x, weight, window_strides=(STRIDE, STRIDE),
        padding=[(PADDING, PADDING), (PADDING, PADDING)],
        dimension_numbers=("NCHW", "OIHW", "NCHW"),
    ) + bias[None, :, None, None]
    ref = jnp.maximum(ref, 0.0)
    assert y.shape == (N, COUT, H, W)
    assert jnp.allclose(y, ref, atol=1e-4, rtol=1e-4)

    print("KERNEL_OK")
</pallas_src>

<mosaic_0001>
module attributes {stable_mosaic.version = 11 : i64} {
  func.func @kernel(%arg0: i32, %arg1: memref<1x16x64xf32, #tpu.memory_space<vmem>>, %arg2: memref<3x64x128xf32, #tpu.memory_space<vmem>>, %arg3: memref<1x128xf32, #tpu.memory_space<vmem>>, %arg4: memref<1x16x128xf32, #tpu.memory_space<vmem>>, %arg5: memref<1x18x64xf32, #tpu.memory_space<vmem>>) attributes {dimension_semantics = [#tpu.dimension_semantics<parallel>], iteration_bounds = array<i64: 2>, scalar_prefetch = 0 : i64, scratch_operands = 1 : i64, tpu.core_type = #tpu.core_type<tc>, window_params = [{transform_indices = @transform_0, window_bounds = array<i64: 1, 16, 64>}, {pipeline_mode = #tpu.pipeline_mode<synchronous>, transform_indices = @transform_1, window_bounds = array<i64: 3, 64, 128>}, {pipeline_mode = #tpu.pipeline_mode<synchronous>, transform_indices = @transform_2, window_bounds = array<i64: 1, 128>}, {transform_indices = @transform_3, window_bounds = array<i64: 1, 16, 128>}]} {
    %cst = arith.constant 0.000000e+00 : f32
    %0 = vector.broadcast %cst : f32 to vector<1x18x64xf32>
    %c0 = arith.constant 0 : index
    %c0_0 = arith.constant 0 : index
    %c0_1 = arith.constant 0 : index
    %1 = vector.load %arg5[%c0, %c0_0, %c0_1] : memref<1x18x64xf32, #tpu.memory_space<vmem>>, vector<1x18x64xf32>
    tpu.vector_store %arg5[%c0, %c0_0, %c0_1], %0 {strides = array<i32>} : memref<1x18x64xf32, #tpu.memory_space<vmem>>, vector<1x18x64xf32>,
    %c0_2 = arith.constant 0 : index
    %c0_3 = arith.constant 0 : index
    %c0_4 = arith.constant 0 : index
    %2 = vector.load %arg1[%c0_2, %c0_3, %c0_4] : memref<1x16x64xf32, #tpu.memory_space<vmem>>, vector<1x16x64xf32>
    %c0_5 = arith.constant 0 : index
    %c1 = arith.constant 1 : index
    %c0_6 = arith.constant 0 : index
    %3 = vector.load %arg5[%c0_5, %c1, %c0_6] : memref<1x18x64xf32, #tpu.memory_space<vmem>>, vector<1x16x64xf32>
    tpu.vector_store %arg5[%c0_5, %c1, %c0_6], %2 {strides = array<i32>} : memref<1x18x64xf32, #tpu.memory_space<vmem>>, vector<1x16x64xf32>,
    %c0_7 = arith.constant 0 : index
    %c0_8 = arith.constant 0 : index
    %4 = vector.load %arg3[%c0_7, %c0_8] : memref<1x128xf32, #tpu.memory_space<vmem>>, vector<1x128xf32>
    %cst_9 = arith.constant 0.000000e+00 : f32
    %5 = vector.broadcast %cst_9 : f32 to vector<16x128xf32>
    %c0_10 = arith.constant 0 : index
    %c0_11 = arith.constant 0 : index
    %c0_12 = arith.constant 0 : index
    %6 = vector.load %arg5[%c0_10, %c0_11, %c0_12] : memref<1x18x64xf32, #tpu.memory_space<vmem>>, vector<1x16x64xf32>
    %7 = vector.shape_cast %6 : vector<1x16x64xf32> to vector<16x64xf32>
    %c0_13 = arith.constant 0 : index
    %c0_14 = arith.constant 0 : index
    %c0_15 = arith.constant 0 : index
    %8 = vector.load %arg2[%c0_13, %c0_14, %c0_15] : memref<3x64x128xf32, #tpu.memory_space<vmem>>, vector<1x64x128xf32>
    %9 = vector.shape_cast %8 : vector<1x64x128xf32> to vector<64x128xf32>
    %cst_16 = arith.constant dense<0.000000e+00> : vector<16x128xf32>
    %10 = tpu.matmul %7, %9, %cst_16 {dimension_numbers = #tpu.dot_dimension_numbers<[1], [0], [0], [1], [0, 0, 1, 1], [], []>} : vector<16x64xf32>, vector<64x128xf32>, vector<16x128xf32> -> vector<16x128xf32>
    %11 = arith.addf %5, %10 : vector<16x128xf32>
    %c0_17 = arith.constant 0 : index
    %c1_18 = arith.constant 1 : index
    %c0_19 = arith.constant 0 : index
    %12 = vector.load %arg5[%c0_17, %c1_18, %c0_19] : memref<1x18x64xf32, #tpu.memory_space<vmem>>, vector<1x16x64xf32>
    %13 = vector.shape_cast %12 : vector<1x16x64xf32> to vector<16x64xf32>
    %c1_20 = arith.constant 1 : index
    %c0_21 = arith.constant 0 : index
    %c0_22 = arith.constant 0 : index
    %14 = vector.load %arg2[%c1_20, %c0_21, %c0_22] : memref<3x64x128xf32, #tpu.memory_space<vmem>>, vector<1x64x128xf32>
    %15 = vector.shape_cast %14 : vector<1x64x128xf32> to vector<64x128xf32>
    %cst_23 = arith.constant dense<0.000000e+00> : vector<16x128xf32>
    %16 = tpu.matmul %13, %15, %cst_23 {dimension_numbers = #tpu.dot_dimension_numbers<[1], [0], [0], [1], [0, 0, 1, 1], [], []>} : vector<16x64xf32>, vector<64x128xf32>, vector<16x128xf32> -> vector<16x128xf32>
    %17 = arith.addf %11, %16 : vector<16x128xf32>
    %c0_24 = arith.constant 0 : index
    %c2 = arith.constant 2 : index
    %c0_25 = arith.constant 0 : index
    %18 = vector.load %arg5[%c0_24, %c2, %c0_25] : memref<1x18x64xf32, #tpu.memory_space<vmem>>, vector<1x16x64xf32>
    %19 = vector.shape_cast %18 : vector<1x16x64xf32> to vector<16x64xf32>
    %c2_26 = arith.constant 2 : index
    %c0_27 = arith.constant 0 : index
    %c0_28 = arith.constant 0 : index
    %20 = vector.load %arg2[%c2_26, %c0_27, %c0_28] : memref<3x64x128xf32, #tpu.memory_space<vmem>>, vector<1x64x128xf32>
    %21 = vector.shape_cast %20 : vector<1x64x128xf32> to vector<64x128xf32>
    %cst_29 = arith.constant dense<0.000000e+00> : vector<16x128xf32>
    %22 = tpu.matmul %19, %21, %cst_29 {dimension_numbers = #tpu.dot_dimension_numbers<[1], [0], [0], [1], [0, 0, 1, 1], [], []>} : vector<16x64xf32>, vector<64x128xf32>, vector<16x128xf32> -> vector<16x128xf32>
    %23 = arith.addf %17, %22 : vector<16x128xf32>
    %24 = vector.broadcast %4 : vector<1x128xf32> to vector<16x128xf32>
    %25 = arith.addf %23, %24 : vector<16x128xf32>
    %cst_30 = arith.constant 0.000000e+00 : f32
    %26 = vector.broadcast %cst_30 : f32 to vector<16x128xf32>
    %27 = arith.maximumf %25, %26 : vector<16x128xf32>
    %c0_31 = arith.constant 0 : index
    %c0_32 = arith.constant 0 : index
    %c0_33 = arith.constant 0 : index
    %28 = vector.load %arg4[%c0_31, %c0_32, %c0_33] : memref<1x16x128xf32, #tpu.memory_space<vmem>>, vector<1x16x128xf32>
    %29 = vector.shape_cast %28 : vector<1x16x128xf32> to vector<16x128xf32>
    %30 = vector.shape_cast %27 : vector<16x128xf32> to vector<1x16x128xf32>
    tpu.vector_store %arg4[%c0_31, %c0_32, %c0_33], %30 {strides = array<i32>} : memref<1x16x128xf32, #tpu.memory_space<vmem>>, vector<1x16x128xf32>,
    return
  }
  func.func @transform_0(%arg0: i32) -> (i32, i32, i32) {
    %c0_i32 = arith.constant 0 : i32
    %c0_i32_0 = arith.constant 0 : i32
    %c0_i32_1 = arith.constant 0 : i32
    return %arg0, %c0_i32, %c0_i32_0 : i32, i32, i32
  }
  func.func @transform_1(%arg0: i32) -> (i32, i32, i32) {
    %c0_i32 = arith.constant 0 : i32
    %c0_i32_0 = arith.constant 0 : i32
    %c0_i32_1 = arith.constant 0 : i32
    %c0_i32_2 = arith.constant 0 : i32
    return %c0_i32, %c0_i32_0, %c0_i32_1 : i32, i32, i32
  }
  func.func @transform_2(%arg0: i32) -> (i32, i32) {
    %c0_i32 = arith.constant 0 : i32
    %c0_i32_0 = arith.constant 0 : i32
    %c0_i32_1 = arith.constant 0 : i32
    return %c0_i32, %c0_i32_0 : i32, i32
  }
  func.func @transform_3(%arg0: i32) -> (i32, i32, i32) {
    %c0_i32 = arith.constant 0 : i32
    %c0_i32_0 = arith.constant 0 : i32
    %c0_i32_1 = arith.constant 0 : i32
    return %arg0, %c0_i32, %c0_i32_0 : i32, i32, i32
  }
}

</mosaic_0001>

<bundles_post_ra>
// kernel: tpu_custom_call.1
= control target key start
LH: loop header
LB: loop body
LE: loop exit
PB: predicated region body
PF: predicated region fallthrough
CT: control target
= control target key end

     0   :  { %8 = vsyncpa [#allocation4], 0  ;;  %s865_s0 = inlined_call_operand.hbm [shape: f32[2,16,64], index: 0, kind: input, shape index: {}]   ;;  %s866_s1 = inlined_call_operand.hbm [shape: f32[3,64,128], index: 1, kind: input, shape index: {}]   ;;  %s867_s2 = inlined_call_operand.vmem [shape: f32[1,128], index: 2, kind: input, shape index: {}]   ;;  %s868_s3 = inlined_call_operand.hbm [shape: f32[2,16,128], index: 3, kind: output, shape index: {}]  }
   0x1   :  { %10 = vsyncpa [#allocation4 + $0x1], 0 }
   0x2   :  { %11 = vsyncpa [#allocation7], 0 }
   0x3   :  { %12 = vsyncpa [#allocation5], 0 }
   0x4   :  { %14 = vsyncpa [#allocation5 + $0x1], 0  ;;  %s700_s12 = smov 0   ;;  %s702_s13 = smov 0  }
   0x5   :  { %s704_s14 = smov 0   ;;  %s706_s15 = smov 0  }
   0x6 LB: > { %s721_s16 = sadd.s32 4294967295, %s672_s15   ;;  %s447_s17 = sadd.s32 4294967294, %s672_s15   ;;  %s672_s15 = sphi %s706_s15, %s878_s15   ;;  %s668_s14 = sphi %s704_s14, %s877_s14   ;;  %s664_s13 = sphi %s702_s13, %s876_s13   ;;  %s660_s12 = sphi %s700_s12, %s875_s12  }
   0x7   : > { %p40_p0 = scmp.ne.s32.totalorder %s664_s13, %s660_s12  ;;  %p41_p1 = scmp.eq.s32.totalorder %s721_s16, 0 }
   0x8   : > { %p106_p2 = scmp.eq.s32.totalorder %s721_s16, 1  ;;  %p112_p3 = scmp.eq.s32.totalorder %s447_s17, 1 }
   0x9   : > { %p730_p4 = por %p41_p1, %p40_p0  ;;  %p448_p5 = scmp.ge.s32.totalorder %s672_s15, 1 }
   0xa   : > { %p735_p6 = por %p112_p3, %p40_p0  ;;  %p119_p7 = scmp.lt.s32.totalorder %s672_s15, 3 }
   0xb   : > { %s130_s22 = sshll.u32 %s866_s1, 4  ;;  %s674_s24 = smov [#allocation6]   ;;  %s131_s22 = int_to_ptr.hbm [resolvable:$true] %s130_s22 }
   0xc   : > { %p743_p8 = pnand %p448_p5, %p119_p7  ;;  %s132_s25 = sshll.u32 %s674_s24, 4  ;;  %s133_s25 = int_to_ptr.vmem [resolvable:$true] %s132_s25 }
   0xd   : > { %s753_s26 = sadd.s32 1, %s672_s15   ;;  %s675_s27 = smov 128  }
   0xe   : > { %p487_p9 = pneg %p743_p8  ;;  %s676_s28 = smov 8  }
   0xf   : > { %s24_s29 = ssub.s32 %s672_s15, %s753_s26  ;;  %s27_s30 = sadd.s32 1, %s668_s14 }
  0x10   : > { %p488_p10 = pnand %p487_p9, %p41_p1  ;;  %p25_p12 = scmp.eq.s32.totalorder %s24_s29, 0 }
  0x11   : > { %p34_p13 = scmp.ne.s32.totalorder %s668_s14, %s664_s13  ;;  %p35_p0 = scmp.eq.s32.totalorder %s672_s15, 0 }
  0x12   : > { %490 = dma.hbm_to_vmem [thread:$0]  (!%p488_p10), %s131_s22, 3072, %s133_s25, [#allocation7], %s675_s27, %s675_s27, %s676_s28  }
  0x13   : > { %s765_s4 = scalar_select %p25_p12, %s668_s14, %s27_s30  }
  0x14   : > { %p769_p3 = por %p106_p2, %p34_p13  ;;  %p500_p5 = scmp.lt.s32.totalorder %s672_s15, 2 }
  0x15   : > { %s149_s6 = sand.u32 1, %s668_s14   ;;  %s469_s7 = sshll.u32 %s672_s15, 4 }
  0x16   : > { %p36_p7 = por %p35_p0, %p34_p13  ;;  %s451_s8 = sshll.u32 %s149_s6, 4 }
  0x17   : > { %s158_s11 = scalar_lea.hbm %s865_s0, %s469_s7  ;;  %s153_s20 = scalar_lea.vmem [#allocation3], %s451_s8 }
  0x18   : > { %s159_s17 = sshll.u32 %s158_s11, 4  ;;  %s161_s21 = sshll.u32 %s153_s20, 4  ;;  %s160_s17 = int_to_ptr.hbm [resolvable:$true] %s159_s17  ;;  %s162_s21 = int_to_ptr.vmem [resolvable:$true] %s161_s21 }
  0x19   : > { %p779_p9 = pnand %p500_p5, %p36_p7  ;;  %s150_s24 = scalar_lea.sflag [#allocation4], %s149_s6 }
  0x1a   : > { %s572_s25 = sshra.s32 %s160_s17, 4  ;;  %s579_s8 = scalar_lea.hbm %s865_s0, 32  ;;  %s573_s25 = int_to_ptr.hbm [resolvable:$true] %s572_s25 }
  0x1b   : > { %s574_s29 = scalar_lea.hbm %s573_s25, 16  ;;  %p576_p10 = pneg %p779_p9 }
  0x1c   : > { %p575_p2 = scmp.ne.s32.totalorder %s573_s25, %s574_s29  ;;  %p580_p0 = scmp.lt.s32.totalorder %s573_s25, %s865_s0 }
  0x1d   : > { %p581_p5 = scmp.lt.s32.totalorder %s579_s8, %s574_s29 }
  0x1e   : > { %p577_p12 = pnand %p576_p10, %p575_p2 }
  0x1f   : > { %p582_p7 = por %p581_p5, %p580_p0 }
  0x20   : > { %p578_p13 = pneg %p577_p12 }
  0x22   : > { %p583_p11 = pnand %p582_p7, %p578_p13 }
  0x24   : > { %586 = shalt.err (!%p583_p11)
}
  0x25   : > { %494 = dma.hbm_to_vmem [thread:$0]  (!%p779_p9), %s160_s17, 256, %s162_s21, %s150_s24, %s675_s27, %s675_s27, %s676_s28  }
  0x26   : > { %173 = sbr.rel (%p743_p8) target bundleno = 213 (0xd5), region = 32  ;;  %s799_s6 = sand.u32 (!%p743_p8), 1, %s664_s13  }
  0x27   : > { %s455_s11 = sshll.u32 (!%p743_p8), %s799_s6, 4  ;;  %s176_s20 = scalar_lea.sflag (!%p743_p8), [#allocation4], %s799_s6 }
  0x28   : > { %s805_s25 = scalar_lea.vmem (!%p743_p8), [#allocation3], %s455_s11 }
  0x2b   : > { %647 = dma.done.wait (%p730_p4), %s176_s20, 256  }
  0x2c   : > { %649 = vsyncadd (%p730_p4), %s176_s20, 4294967040 }
  0x2d   : > { %651 = dma.done.wait (%p41_p1), [#allocation7], 3072  }
  0x2e   : > { %653 = vsyncadd (%p41_p1), [#allocation7], 4294964224  ;;  %vm208_vm0 = vcmask 523264   ;;  %vm211_vm1 = vcmask 517120   ;;  %v677_v0 = vmov 0.0   ;;  %v307_v1 = vld [vmem:[#allocation6 + $0xb8] sm:$0xff] }
  0x2f   : > { %209 = vst.msk [vmem:[#allocation2] sm:$0xff] %vm208_vm0, %v677_v0  ;;  %v306_v2 = vld [vmem:[#allocation6 + $0xb0] sm:$0xff]  ;;  %v238_v3 = vld [vmem:[#allocation6 + $0x78] sm:$0xff]  ;;  %322 = vmatpush.msra.mxu2 %v307_v1  ;;  %v305_v6 = vld [vmem:[#allocation6 + $0xa8] sm:$0xff]  ;;  %s470_s27 = sshll.u32 %s721_s16, 4  ;;  %s207_s22 = scalar_lea.vmem [#allocation8], %s455_s11 }
  0x30   : > { %210 = vst.msk [vmem:[#allocation2 + $0x8] sm:$0xff] %vm208_vm0, %v677_v0  ;;  %253 = vmatpush.msra.mxu0 %v238_v3  ;;  %v227_v4 = vld [vmem:[#allocation6 + $0x38] sm:$0xff]  ;;  %v237_v5 = vld [vmem:[#allocation6 + $0x70] sm:$0xff]  ;;  %471 = vmatpush.msra.mxu3 %v238_v3  ;;  %v236_v8 = vld [vmem:[#allocation6 + $0x68] sm:$0xff]  ;;  %s360_s21 = scalar_lea.hbm %s868_s3, %s470_s27  ;;  %s361_s24 = sshll.u32 %s207_s22, 4  ;;  %s362_s24 = int_to_ptr.vmem [resolvable:$true] %s361_s24 }
  0x31   : > { %212 = vst.msk [vmem:[#allocation2 + $0x10] sm:$0x3] %vm211_vm1, %v677_v0  ;;  %282 = vmatpush.msra.mxu1 %v227_v4  ;;  %v226_v7 = vld [vmem:[#allocation6 + $0x30] sm:$0xff]  ;;  %323 = vmatpush.msra.mxu2 %v306_v2  ;;  %v225_v9 = vld [vmem:[#allocation6 + $0x28] sm:$0xff]  ;;  %v304_v10 = vld [vmem:[#allocation6 + $0xa0] sm:$0xff]  ;;  %s363_s29 = sshll.u32 %s360_s21, 4  ;;  %s364_s29 = int_to_ptr.hbm [resolvable:$true] %s363_s29 }
  0x32   : > { %254 = vmatpush.msra.mxu0 %v237_v5  ;;  %472 = vmatpush.msra.mxu3 %v237_v5  ;;  %v235_v11 = vld [vmem:[#allocation6 + $0x60] sm:$0xff]  ;;  %v303_v13 = vld [vmem:[#allocation6 + $0x98] sm:$0xff]  ;;  %v302_v18 = vld [vmem:[#allocation6 + $0x90] sm:$0xff]  ;;  %s349_s16 = scalar_lea.sflag [#allocation5], %s799_s6  ;;  %s616_s30 = sshra.s32 %s364_s29, 4  ;;  %s617_s30 = int_to_ptr.hbm [resolvable:$true] %s616_s30 }
  0x33   : > { %283 = vmatpush.msra.mxu1 %v226_v7  ;;  %324 = vmatpush.msra.mxu2 %v305_v6  ;;  %v224_v12 = vld [vmem:[#allocation6 + $0x20] sm:$0xff]  ;;  %v234_v14 = vld [vmem:[#allocation6 + $0x58] sm:$0xff]  ;;  %v233_v19 = vld [vmem:[#allocation6 + $0x50] sm:$0xff]  ;;  %s618_s7 = scalar_lea.hbm %s617_s30, 16  ;;  %s622_s10 = scalar_lea.hbm %s868_s3, 32 }
  0x34   : > { %255 = vmatpush.msra.mxu0 %v236_v8  ;;  %473 = vmatpush.msra.mxu3 %v236_v8  ;;  %v213_v15 = vld [vmem:[%s805_s25] sm:$0xff]  ;;  %v223_v16 = vld [vmem:[#allocation6 + $0x18] sm:$0xff]  ;;  %v301_v21 = vld [vmem:[#allocation6 + $0x88] sm:$0xff]  ;;  %p619_p1 = scmp.ne.s32.totalorder %s617_s30, %s618_s7  ;;  %p623_p11 = scmp.lt.s32.totalorder %s617_s30, %s868_s3 }
  0x35   : > { %284 = vmatpush.msra.mxu1 %v225_v9  ;;  %325 = vmatpush.msra.mxu2 %v304_v10  ;;  %v214_v17 = vld [vmem:[%s805_s25 + $0x8] sm:$0xff]  ;;  %215 = vst.msk [vmem:[#allocation2 + $0x1] sm:$0xff] %vm208_vm0, %v213_v15  ;;  %v222_v20 = vld [vmem:[#allocation6 + $0x10] sm:$0xff]  ;;  %v300_v24 = vld [vmem:[#allocation6 + $0x80] sm:$0xff]  ;;  %p624_p9 = scmp.lt.s32.totalorder %s622_s10, %s618_s7 }
  0x36   : > { %256 = vmatpush.msra.mxu0 %v235_v11  ;;  %474 = vmatpush.msra.mxu3 %v235_v11  ;;  %216 = vst.msk [vmem:[#allocation2 + $0x9] sm:$0xff] %vm208_vm0, %v214_v17  ;;  %v232_v22 = vld [vmem:[#allocation6 + $0x48] sm:$0xff]  ;;  %v231_v25 = vld [vmem:[#allocation6 + $0x40] sm:$0xff]  ;;  %p620_p4 = pnand %p619_p1, %p769_p3 }
  0x37   : > { %285 = vmatpush.msra.mxu1 %v224_v12  ;;  %326 = vmatpush.msra.mxu2 %v303_v13  ;;  %v221_v23 = vld [vmem:[#allocation6 + $0x8] sm:$0xff]  ;;  %v220_v26 = vld [vmem:[#allocation6] sm:$0xff]  ;;  %p625_p2 = por %p624_p9, %p623_p11 }
  0x38   : > { %257 = vmatpush.msra.mxu0 %v234_v14  ;;  %475 = vmatpush.msra.mxu3 %v234_v14  ;;  %v541_v36 = vld [vmem:[%s867_s2] ss:$0 sm:$0xff]  ;;  %p621_p8 = pneg %p620_p4 }
  0x39   : > { %286 = vmatpush.msra.mxu1 %v223_v16  ;;  %327 = vmatpush.msra.mxu2 %v302_v18 }
  0x3a   : > { %258 = vmatpush.msra.mxu0 %v233_v19  ;;  %476 = vmatpush.msra.mxu3 %v233_v19  ;;  %p626_p10 = pnand %p625_p2, %p621_p8 }
  0x3b   : > { %287 = vmatpush.msra.mxu1 %v222_v20  ;;  %328 = vmatpush.msra.mxu2 %v301_v21 }
  0x3c   : > { %259 = vmatpush.msra.mxu0 %v232_v22  ;;  %477 = vmatpush.msra.mxu3 %v232_v22  ;;  %v228_v27 = vld [vmem:[#allocation2 + $0x1] sm:$0xff] }
  0x3d   : > { %288 = vmatpush.msra.mxu1 %v221_v23  ;;  %v218_v28 = vld [vmem:[#allocation2] sm:$0xff]  ;;  %329 = vmatpush.msra.mxu2 %v300_v24  ;;  %v229_v30 = vld [vmem:[#allocation2 + $0x9] sm:$0xff] }
  0x3e   : > { %v297_v29 = vld [vmem:[#allocation2 + $0x2] sm:$0xff]  ;;  %260 = vmatpush.msra.mxu0 %v231_v25  ;;  %478 = vmatpush.msra.mxu3 %v231_v25  ;;  %v298_v31 = vld [vmem:[#allocation2 + $0xa] sm:$0xff] }
  0x3f   : > { %462 = vmatmul.msk.f32.vlgmr.msra.gmra.mxu2 %vm208_vm0, %v297_v29  ;;  %289 = vmatpush.msra.mxu1 %v220_v26  ;;  %v219_v32 = vld [vmem:[#allocation2 + $0x8] sm:$0xff] }
  0x40   : > { %458 = vmatmul.msk.f32.vlgmr.msra.gmra.mxu0 %vm208_vm0, %v228_v27  ;;  %460 = vmatmul.msk.f32.vlgmr.msra.gmra.mxu1 %vm208_vm0, %v218_v28 }
  0x41   : > { %459 = vmatmul.msk.f32.vlgmr.msra.gmra.mxu3 %vm208_vm0, %v229_v30 }
  0x47   : > { %463 = vmatmul.msk.f32.gmra.mxu2 %vm208_vm0, %v298_v31 }
  0x48   : > { %461 = vmatmul.msk.f32.gmra.mxu1 %vm208_vm0, %v219_v32 }
  0xbd   : > { %v262_v33 = vpop.f32.mrf.mxu0  ;;  %v291_v34 = vpop.f32.mrf.mxu1 }
  0xbe   : > { %v292_v35 = vadd.f32 %v291_v34, %v262_v33 }
  0xc2   : > { %v331_v37 = vpop.f32.mrf.mxu2 }
  0xc3   : > { %v337_v38 = vadd.f32 %v331_v37, %v292_v35 }
  0xc4   : > { %v265_v40 = vpop.f32.mrf.mxu3 }
  0xc5   : > { %v342_v39 = vadd.f32 %v541_v36, %v337_v38  ;;  %v294_v41 = vpop.f32.mrf.mxu1 }
  0xc6   : > { %v295_v43 = vadd.f32 %v294_v41, %v265_v40 }
  0xc7   : > { %v344_v42 = vmax.f32 %v342_v39, 0.0 }
  0xc9   : > { %346 = vst [vmem:[%s207_s22] sm:$0xff] %v344_v42 }
  0xca   : > { %v334_v44 = vpop.f32.mrf.mxu2 }
  0xcb   : > { %v338_v45 = vadd.f32 %v334_v44, %v295_v43 }
  0xcd   : > { %v343_v46 = vadd.f32 %v541_v36, %v338_v45 }
  0xcf   : > { %v345_v47 = vmax.f32 %v343_v46, 0.0 }
  0xd1   : > { %347 = vst [vmem:[%s207_s22 + $0x8] sm:$0xff] %v345_v47 }
  0xd2   : > { %629 = shalt.err (!%p626_p10)
}
  0xd3   : > { %s678_s6 = smov 128   ;;  %s679_s25 = smov 8  }
  0xd4   : > { %485 = dma.vmem_to_hbm [thread:$0]  (%p769_p3), %s362_s24, 256, %s364_s29, %s349_s16, %s678_s6, %s678_s6, %s679_s25  }
  0xd5 PF: > { %s378_s18 = sand.u32 1, %s660_s12   ;;  %p874_p12 = scmp.ge.s32.totalorder %s672_s15, 2 }
  0xd6   : > { %s379_s23 = scalar_lea.sflag [#allocation5], %s378_s18 }
  0xd7   : > { %p496_p13 = pnand %p874_p12, %p735_p6 }
  0xd9   : > { %p497_p0 = pneg %p496_p13 }
  0xdb   : > { %655 = dma.done.wait (%p497_p0), %s379_s23, 256  }
  0xdc   : > { %657 = vsyncadd (%p497_p0), %s379_s23, 4294967040  ;;  %p17_p5 = scmp.ge.s32.totalorder %s753_s26, 4   ;;  %s875_s12 = smov %s664_s13 }
  0xdd   : > { %s876_s13 = smov %s668_s14  ;;  %s877_s14 = smov %s765_s4 }
  0xde   : > { %s878_s15 = smov %s753_s26  ;;  %19 = sbr.rel (!%p17_p5) target bundleno = 6 (0x6), region = 83 }
  0xe3   :  { %385 = vsyncpa [#allocation4], 1 }
  0xe4   :  { %387 = vsyncpa [#allocation4 + $0x1], 1 }
  0xe5   :  { %388 = vsyncpa [#allocation7], 1 }
  0xe6   :  { %389 = vsyncpa [#allocation5], 1 }
  0xe7   :  { %391 = vsyncpa [#allocation5 + $0x1], 1 }

</bundles_post_ra>
